<compile_context>
chip_gen: v7x
topology: tpu7x:2x2x1
jax: 0.10.0
libtpu: 0.0.40
codegen_flags: <defaults>
</compile_context>

<pallas_src>
import functools

import jax
import jax.numpy as jnp
from jax.experimental import pallas as pl
from jax.experimental.pallas import tpu as pltpu


def _coordconv1d_kernel(x_ref, w_ref, be_ref, o_ref, col_ref, *,
                        cin, ksize, xout, pad, length):
    # x_ref:   (Bblk, Cin, L)        raw (unpadded) input block
    # w_ref:   (Bblk, Cout, K*Cin)   weight slab, tiled over the batch block
    # be_ref:  (Cout, Xout)          effective bias (conv bias + coord term)
    # o_ref:   (Bblk, Cout, Xout)    output block
    # col_ref: (Bblk, K*Cin, Xout)   im2col scratch (VMEM)

    # Zero-fill the scratch only if some tap window reaches into the
    # zero-padded border (static, compile-time decision).
    needs_zero = any(
        max(0, pad - k) > 0 or min(xout, length + pad - k) < xout
        for k in range(ksize))
    if needs_zero:
        col_ref[...] = jnp.zeros_like(col_ref)

    # Build im2col with static slices: row (k*Cin + c, t) = x_padded[c, t + k].
    for k in range(ksize):
        s = k - pad                      # input offset for this tap
        lo = max(0, -s)                  # first valid output position
        hi = min(xout, length - s)       # one past last valid output position
        if hi > lo:
            col_ref[:, k * cin:(k + 1) * cin, lo:hi] = x_ref[:, :, lo + s:hi + s]

    # Single batched MXU contraction per grid step, f32 accumulation.
    out = jnp.einsum('bok,bkt->bot', w_ref[...], col_ref[...],
                     preferred_element_type=jnp.float32)
    o_ref[...] = (out + be_ref[...][None]).astype(o_ref.dtype)


def coord_conv1d(x, weight, bias, *, padding=1, block_b=None):
    """CoordConv1d forward (rank=1, with_r=False); stride=1, dilation=1, groups=1.

    x: (B, Cin, L); weight: (Cout, Cin+1, K) with the LAST input channel being
    the coordinate channel; bias: (Cout,).
    """
    B, Cin, L = x.shape
    Cout, Cin1, K = weight.shape
    assert Cin1 == Cin + 1, "CoordConv1d expects conv in_channels == Cin + 1"
    Xout = L + 2 * padding - K + 1
    assert Xout >= 1, "output length must be positive"
    KC = K * Cin

    f32 = jnp.float32
    # --- Effective bias: conv bias + coord-channel contribution. -------------
    # coord is 2*i/(L-1) - 1 inside the sequence and 0 in the conv's
    # zero-padded border.  (L == 1: denom clamped to 1; PyTorch divides by 0.)
    denom = f32(max(L - 1, 1))
    coord = (jnp.arange(L, dtype=f32) / denom) * 2.0 - 1.0
    coord_pad = jnp.pad(coord, (padding, padding))                    # (L+2p,)
    wins = jnp.stack([coord_pad[k:k + Xout] for k in range(K)], 0)    # (K, Xout)
    w_coord = weight[:, Cin, :].astype(f32)                           # (Cout, K)
    bias_eff = bias.astype(f32)[:, None] + w_coord @ wins             # (Cout, Xout)

    # --- Weight as one lane-contiguous slab: w2[o, k*Cin + c] = w[o, c, k]. --
    w2 = jnp.transpose(weight[:, :Cin, :], (0, 2, 1)).reshape(Cout, KC)

    # --- Batch block size: amortize per-step overhead, keep >= 2 grid steps
    #     when B >= 2 (v7x megacore), stay well inside scoped VMEM. ----------
    if block_b is None:
        per_b_bytes = 4 * (Cin * L + KC * Xout + Cout * Xout)
        vmem_cap = max(1, (4 << 20) // max(per_b_bytes, 1))
        block_b = max(1, min(vmem_cap, -(-B // 2)))
    block_b = int(min(block_b, B))
    nb = pl.cdiv(B, block_b)

    w_tiled = jnp.tile(w2[None], (block_b, 1, 1))                     # (Bblk, Cout, KC)

    kernel = functools.partial(
        _coordconv1d_kernel,
        cin=Cin, ksize=K, xout=Xout, pad=padding, length=L)

    return pl.pallas_call(
        kernel,
        out_shape=jax.ShapeDtypeStruct((B, Cout, Xout), x.dtype),
        grid_spec=pltpu.PrefetchScalarGridSpec(
            num_scalar_prefetch=0,
            grid=(nb,),
            in_specs=[
                pl.BlockSpec((block_b, Cin, L), lambda b: (b, 0, 0)),
                pl.BlockSpec((block_b, Cout, KC), lambda b: (0, 0, 0)),
                pl.BlockSpec((Cout, Xout), lambda b: (0, 0)),
            ],
            out_specs=pl.BlockSpec((block_b, Cout, Xout), lambda b: (b, 0, 0)),
            scratch_shapes=[pltpu.VMEM((block_b, KC, Xout), x.dtype)],
        ),
        compiler_params=pltpu.CompilerParams(
            dimension_semantics=("parallel",)),
    )(x, w_tiled, bias_eff)


def _reference(x, weight, bias, *, padding=1):
    """Pure-JAX reference mirroring AddCoords(rank=1) + nn.Conv1d."""
    B, Cin, L = x.shape
    coord = (jnp.arange(L, dtype=jnp.float32) / jnp.float32(L - 1)) * 2.0 - 1.0
    coord = jnp.broadcast_to(coord[None, None, :], (B, 1, L)).astype(x.dtype)
    x_aug = jnp.concatenate([x, coord], axis=1)                       # (B, Cin+1, L)
    out = jax.lax.conv_general_dilated(
        x_aug, weight, window_strides=(1,), padding=[(padding, padding)],
        dimension_numbers=("NCH", "OIH", "NCH"))
    return out + bias[None, :, None]


if __name__ == "__main__":
    # Module config: CoordConv1d(in_channels=4, out_channels=8, kernel_size=3,
    #                            stride=1, padding=1, bias=True, with_r=False)
    B, Cin, L = 2, 4, 16
    Cout, K, PAD = 8, 3, 1
    Cin1 = Cin + 1

    key = jax.random.PRNGKey(0)
    kx, kw, kb = jax.random.split(key, 3)

    x = jax.random.normal(kx, (B, Cin, L), dtype=jnp.float32)

    # Deterministic Conv1d-style init (uniform in +/- 1/sqrt(fan_in)).
    fan_in = Cin1 * K
    bound = 1.0 / (fan_in ** 0.5)
    weight = jax.random.uniform(kw, (Cout, Cin1, K), jnp.float32, -bound, bound)
    bias = jax.random.uniform(kb, (Cout,), jnp.float32, -bound, bound)

    out = coord_conv1d(x, weight, bias, padding=PAD)
    out = jax.block_until_ready(out)

    ref = _reference(x, weight, bias, padding=PAD)
    assert out.shape == (B, Cout, L), out.shape
    assert jnp.allclose(out, ref, rtol=1e-5, atol=1e-5), \
        float(jnp.max(jnp.abs(out - ref)))

    print("KERNEL_OK")
</pallas_src>

<mosaic_0001>
module attributes {stable_mosaic.version = 11 : i64} {
  func.func @_coordconv1d_kernel(%arg0: i32, %arg1: memref<1x4x16xf32, #tpu.memory_space<vmem>>, %arg2: memref<1x8x12xf32, #tpu.memory_space<vmem>>, %arg3: memref<8x16xf32, #tpu.memory_space<vmem>>, %arg4: memref<1x8x16xf32, #tpu.memory_space<vmem>>, %arg5: memref<1x12x16xf32, #tpu.memory_space<vmem>>) attributes {dimension_semantics = [#tpu.dimension_semantics<parallel>], iteration_bounds = array<i64: 2>, scalar_prefetch = 0 : i64, scratch_operands = 1 : i64, tpu.core_type = #tpu.core_type<tc>, window_params = [{transform_indices = @transform_0, window_bounds = array<i64: 1, 4, 16>}, {pipeline_mode = #tpu.pipeline_mode<synchronous>, transform_indices = @transform_1, window_bounds = array<i64: 1, 8, 12>}, {pipeline_mode = #tpu.pipeline_mode<synchronous>, transform_indices = @transform_2, window_bounds = array<i64: 8, 16>}, {transform_indices = @transform_3, window_bounds = array<i64: 1, 8, 16>}]} {
    %cst = arith.constant 0.000000e+00 : f32
    %0 = vector.broadcast %cst : f32 to vector<1x12x16xf32>
    %c0 = arith.constant 0 : index
    %c0_0 = arith.constant 0 : index
    %c0_1 = arith.constant 0 : index
    %1 = vector.load %arg5[%c0, %c0_0, %c0_1] : memref<1x12x16xf32, #tpu.memory_space<vmem>>, vector<1x12x16xf32>
    tpu.vector_store %arg5[%c0, %c0_0, %c0_1], %0 {strides = array<i32>} : memref<1x12x16xf32, #tpu.memory_space<vmem>>, vector<1x12x16xf32>,
    %c0_2 = arith.constant 0 : index
    %c0_3 = arith.constant 0 : index
    %c0_4 = arith.constant 0 : index
    %2 = vector.load %arg1[%c0_2, %c0_3, %c0_4] : memref<1x4x16xf32, #tpu.memory_space<vmem>>, vector<1x4x15xf32>
    %c0_5 = arith.constant 0 : index
    %c0_6 = arith.constant 0 : index
    %c1 = arith.constant 1 : index
    %3 = vector.load %arg5[%c0_5, %c0_6, %c1] : memref<1x12x16xf32, #tpu.memory_space<vmem>>, vector<1x4x15xf32>
    tpu.vector_store %arg5[%c0_5, %c0_6, %c1], %2 {strides = array<i32>} : memref<1x12x16xf32, #tpu.memory_space<vmem>>, vector<1x4x15xf32>,
    %c0_7 = arith.constant 0 : index
    %c0_8 = arith.constant 0 : index
    %c0_9 = arith.constant 0 : index
    %4 = vector.load %arg1[%c0_7, %c0_8, %c0_9] : memref<1x4x16xf32, #tpu.memory_space<vmem>>, vector<1x4x16xf32>
    %c0_10 = arith.constant 0 : index
    %c4 = arith.constant 4 : index
    %c0_11 = arith.constant 0 : index
    %5 = vector.load %arg5[%c0_10, %c4, %c0_11] : memref<1x12x16xf32, #tpu.memory_space<vmem>>, vector<1x4x16xf32>
    tpu.vector_store %arg5[%c0_10, %c4, %c0_11], %4 {strides = array<i32>} : memref<1x12x16xf32, #tpu.memory_space<vmem>>, vector<1x4x16xf32>,
    %c0_12 = arith.constant 0 : index
    %c0_13 = arith.constant 0 : index
    %c1_14 = arith.constant 1 : index
    %6 = vector.load %arg1[%c0_12, %c0_13, %c1_14] : memref<1x4x16xf32, #tpu.memory_space<vmem>>, vector<1x4x15xf32>
    %c0_15 = arith.constant 0 : index
    %c8 = arith.constant 8 : index
    %c0_16 = arith.constant 0 : index
    %7 = vector.load %arg5[%c0_15, %c8, %c0_16] : memref<1x12x16xf32, #tpu.memory_space<vmem>>, vector<1x4x15xf32>
    tpu.vector_store %arg5[%c0_15, %c8, %c0_16], %6 {strides = array<i32>} : memref<1x12x16xf32, #tpu.memory_space<vmem>>, vector<1x4x15xf32>,
    %c0_17 = arith.constant 0 : index
    %c0_18 = arith.constant 0 : index
    %c0_19 = arith.constant 0 : index
    %8 = vector.load %arg2[%c0_17, %c0_18, %c0_19] : memref<1x8x12xf32, #tpu.memory_space<vmem>>, vector<1x8x12xf32>
    %c0_20 = arith.constant 0 : index
    %c0_21 = arith.constant 0 : index
    %c0_22 = arith.constant 0 : index
    %9 = vector.load %arg5[%c0_20, %c0_21, %c0_22] : memref<1x12x16xf32, #tpu.memory_space<vmem>>, vector<1x12x16xf32>
    "tpu.trace_start"() <{level = 10 : i32, message = "bok,bkt->bot"}> : () -> ()
    %cst_23 = arith.constant dense<0.000000e+00> : vector<1x8x16xf32>
    %10 = tpu.matmul %8, %9, %cst_23 {dimension_numbers = #tpu.dot_dimension_numbers<[2], [1], [1], [2], [0, 0, 0, 1, 1, 2], [0], [0]>} : vector<1x8x12xf32>, vector<1x12x16xf32>, vector<1x8x16xf32> -> vector<1x8x16xf32>
    "tpu.trace_stop"() : () -> ()
    %c0_24 = arith.constant 0 : index
    %c0_25 = arith.constant 0 : index
    %11 = vector.load %arg3[%c0_24, %c0_25] : memref<8x16xf32, #tpu.memory_space<vmem>>, vector<8x16xf32>
    %12 = vector.shape_cast %11 : vector<8x16xf32> to vector<1x8x16xf32>
    %13 = arith.addf %10, %12 : vector<1x8x16xf32>
    %c0_26 = arith.constant 0 : index
    %c0_27 = arith.constant 0 : index
    %c0_28 = arith.constant 0 : index
    %14 = vector.load %arg4[%c0_26, %c0_27, %c0_28] : memref<1x8x16xf32, #tpu.memory_space<vmem>>, vector<1x8x16xf32>
    tpu.vector_store %arg4[%c0_26, %c0_27, %c0_28], %13 {strides = array<i32>} : memref<1x8x16xf32, #tpu.memory_space<vmem>>, vector<1x8x16xf32>,
    return
  }
  func.func @transform_0(%arg0: i32) -> (i32, i32, i32) {
    %c0_i32 = arith.constant 0 : i32
    %c0_i32_0 = arith.constant 0 : i32
    %c0_i32_1 = arith.constant 0 : i32
    return %arg0, %c0_i32, %c0_i32_0 : i32, i32, i32
  }
  func.func @transform_1(%arg0: i32) -> (i32, i32, i32) {
    %c0_i32 = arith.constant 0 : i32
    %c0_i32_0 = arith.constant 0 : i32
    %c0_i32_1 = arith.constant 0 : i32
    %c0_i32_2 = arith.constant 0 : i32
    return %c0_i32, %c0_i32_0, %c0_i32_1 : i32, i32, i32
  }
  func.func @transform_2(%arg0: i32) -> (i32, i32) {
    %c0_i32 = arith.constant 0 : i32
    %c0_i32_0 = arith.constant 0 : i32
    %c0_i32_1 = arith.constant 0 : i32
    return %c0_i32, %c0_i32_0 : i32, i32
  }
  func.func @transform_3(%arg0: i32) -> (i32, i32, i32) {
    %c0_i32 = arith.constant 0 : i32
    %c0_i32_0 = arith.constant 0 : i32
    %c0_i32_1 = arith.constant 0 : i32
    return %arg0, %c0_i32, %c0_i32_0 : i32, i32, i32
  }
}

</mosaic_0001>

<bundles_post_ra>
// kernel: tpu_custom_call.1
= control target key start
LH: loop header
LB: loop body
LE: loop exit
PB: predicated region body
PF: predicated region fallthrough
CT: control target
= control target key end

     0   :  { %8 = vsyncpa [#allocation4], 0  ;;  %s938_s0 = inlined_call_operand.hbm [shape: f32[2,4,16], index: 0, kind: input, shape index: {}]   ;;  %s939_s1 = inlined_call_operand.hbm [shape: f32[1,8,12], index: 1, kind: input, shape index: {}]   ;;  %s940_s2 = inlined_call_operand.hbm [shape: f32[8,16], index: 2, kind: input, shape index: {}]   ;;  %s941_s3 = inlined_call_operand.hbm [shape: f32[2,8,16], index: 3, kind: output, shape index: {}]  }
   0x1   :  { %10 = vsyncpa [#allocation4 + $0x1], 0 }
   0x2   :  { %11 = vsyncpa [#allocation7], 0 }
   0x3   :  { %12 = vsyncpa [#allocation5], 0 }
   0x4   :  { %14 = vsyncpa [#allocation5 + $0x1], 0  ;;  %s710_s12 = smov 0   ;;  %s712_s13 = smov 0  }
   0x5   :  { %s714_s14 = smov 0   ;;  %s716_s15 = smov 0  }
   0x6 LB: > { %s731_s16 = sadd.s32 4294967295, %s678_s15   ;;  %s417_s17 = sadd.s32 4294967294, %s678_s15   ;;  %s678_s15 = sphi %s716_s15, %s961_s15   ;;  %s674_s14 = sphi %s714_s14, %s960_s14   ;;  %s670_s13 = sphi %s712_s13, %s959_s13   ;;  %s666_s12 = sphi %s710_s12, %s958_s12  }
   0x7   : > { %p40_p0 = scmp.ne.s32.totalorder %s670_s13, %s666_s12  ;;  %p942_p1 = scmp.eq.s32.totalorder %s731_s16, 0 }
   0x8   : > { %p112_p3 = scmp.eq.s32.totalorder %s417_s17, 1  ;;  %p418_p5 = scmp.ge.s32.totalorder %s678_s15, 1 }
   0x9   : > { %p740_p4 = por %p942_p1, %p40_p0  ;;  %p119_p7 = scmp.lt.s32.totalorder %s678_s15, 3 }
   0xa   : > { %p745_p6 = por %p112_p3, %p40_p0  ;;  %s680_s21 = smov [#allocation6]  }
   0xb   : > { %s945_s18 = scalar_select %p740_p4, 1, 0 }
   0xc   : > { %s946_s19 = scalar_select %p745_p6, 1, 0 }
   0xd   : > { %p750_p8 = pnand %p418_p5, %p119_p7  ;;  %s132_s22 = sshll.u32 %s680_s21, 4  ;;  %s133_s22 = int_to_ptr.vmem [resolvable:$true] %s132_s22 }
   0xe   : > { %s681_s23 = smov [#allocation8]   ;;  %s766_s26 = sadd.s32 1, %s678_s15  }
   0xf   : > { %s947_s20 = scalar_select %p750_p8, 1, 0 }
  0x10   : > { %p461_p10 = pneg %p750_p8  ;;  %s143_s24 = sshll.u32 %s681_s23, 4  ;;  %s763_s24 = int_to_ptr.vmem [resolvable:$true] %s143_s24 }
  0x11   : > { %s24_s27 = ssub.s32 %s678_s15, %s766_s26  ;;  %s522_s30 = scalar_lea.hbm %s939_s1, 128 }
  0x12   : > { %p759_p11 = pnand %p461_p10, %p942_p1  ;;  %p523_p12 = scmp.ne.s32.totalorder %s939_s1, %s522_s30 }
  0x13   : > { %p529_p5 = scmp.lt.u32.totalorder %s522_s30, %s939_s1 }
  0x14   : > { %p524_p13 = pneg %p759_p11 }
  0x16   : > { %p525_p0 = pnand %p524_p13, %p523_p12 }
  0x18   : > { %p526_p3 = pneg %p525_p0 }
  0x1a   : > { %p531_p7 = pnand %p529_p5, %p526_p3 }
  0x1c   : > { %534 = shalt.err (!%p531_p7)
}
  0x1d   : > { %s535_s8 = scalar_lea.vmem %s133_s22, 128  ;;  %p543_p2 = scmp.lt.s32.totalorder %s133_s22, %s133_s22 }
  0x1e   : > { %p536_p10 = scmp.ne.s32.totalorder %s133_s22, %s535_s8  ;;  %p544_p6 = scmp.lt.s32.totalorder %s535_s8, %s535_s8 }
  0x20   : > { %p538_p9 = pnand %p536_p10, %p524_p13  ;;  %p545_p4 = por %p544_p6, %p543_p2 }
  0x22   : > { %p539_p1 = pneg %p538_p9 }
  0x24   : > { %p546_p8 = pnand %p545_p4, %p539_p1 }
  0x26   : > { %549 = shalt.err (!%p546_p8)
}
  0x27   : > { %464 = dma.hbm_to_vmem [thread:$0]  (!%p759_p11), %s939_s1, 128, %s133_s22, [#allocation7]  }
  0x28   : > { %s550_s21 = scalar_lea.hbm %s940_s2, 128 }
  0x29   : > { %p551_p9 = scmp.ne.s32.totalorder %s940_s2, %s550_s21  ;;  %p557_p4 = scmp.lt.u32.totalorder %s550_s21, %s940_s2 }
  0x2b   : > { %p553_p2 = pnand %p551_p9, %p524_p13 }
  0x2d   : > { %p554_p1 = pneg %p553_p2 }
  0x2f   : > { %p559_p6 = pnand %p557_p4, %p554_p1 }
  0x31   : > { %562 = shalt.err (!%p559_p6)
}
  0x32   : > { %s563_s22 = scalar_lea.vmem %s763_s24, 128  ;;  %p571_p3 = scmp.lt.s32.totalorder %s763_s24, %s763_s24 }
  0x33   : > { %p564_p8 = scmp.ne.s32.totalorder %s763_s24, %s563_s22  ;;  %p572_p5 = scmp.lt.s32.totalorder %s563_s22, %s563_s22 }
  0x35   : > { %p566_p12 = pnand %p564_p8, %p524_p13  ;;  %p573_p7 = por %p572_p5, %p571_p3 }
  0x37   : > { %p567_p0 = pneg %p566_p12 }
  0x39   : > { %p574_p10 = pnand %p573_p7, %p567_p0 }
  0x3b   : > { %577 = shalt.err (!%p574_p10)
}
  0x3c   : > { %467 = dma.hbm_to_vmem [thread:$0]  (!%p759_p11), %s940_s2, 128, %s763_s24, [#allocation7]  }
  0x3d   : > { %p25_p13 = scmp.eq.s32.totalorder %s24_s27, 0  ;;  %s27_s6 = sadd.s32 1, %s674_s14 }
  0x3e   : > { %p34_p9 = scmp.ne.s32.totalorder %s674_s14, %s670_s13  ;;  %p35_p2 = scmp.eq.s32.totalorder %s678_s15, 0 }
  0x3f   : > { %s825_s25 = scalar_select %p25_p13, %s674_s14, %s27_s6  }
  0x40   : > { %p36_p1 = por %p35_p2, %p34_p9  ;;  %p949_p4 = scmp.eq.s32.totalorder %s731_s16, 1 }
  0x41   : > { %p478_p8 = scmp.lt.s32.totalorder %s678_s15, 2  ;;  %s154_s8 = sand.u32 1, %s674_s14  }
  0x42   : > { %p829_p6 = por %p949_p4, %p34_p9  ;;  %s422_s9 = sshll.u32 %s154_s8, 2 }
  0x43   : > { %s423_s10 = sshll.u32 %s678_s15, 6  ;;  %s158_s27 = scalar_lea.vmem [#allocation3], %s422_s9 }
  0x44   : > { %s839_s24 = scalar_lea.hbm %s938_s0, %s423_s10  ;;  %s165_s21 = sshll.u32 %s158_s27, 4  ;;  %s841_s21 = int_to_ptr.vmem [resolvable:$true] %s165_s21 }
  0x45   : > { %p843_p11 = pnand %p478_p8, %p36_p1  ;;  %s155_s28 = scalar_lea.sflag [#allocation4], %s154_s8 }
  0x46   : > { %s578_s29 = scalar_lea.hbm %s839_s24, 64  ;;  %s583_s4 = scalar_lea.hbm %s938_s0, 128 }
  0x47   : > { %p579_p12 = scmp.ne.s32.totalorder %s839_s24, %s578_s29  ;;  %p580_p0 = pneg %p843_p11 }
  0x48   : > { %p584_p7 = scmp.lt.u32.totalorder %s839_s24, %s938_s0  ;;  %p585_p10 = scmp.lt.u32.totalorder %s583_s4, %s578_s29 }
  0x49   : > { %p581_p3 = pnand %p580_p0, %p579_p12  ;;  %p587_p9 = scmp.lt.u32.totalorder %s578_s29, %s839_s24 }
  0x4a   : > { %p586_p13 = por %p585_p10, %p584_p7 }
  0x4b   : > { %p582_p5 = pneg %p581_p3 }
  0x4c   : > { %p588_p2 = por %p587_p9, %p586_p13 }
  0x4e   : > { %p589_p1 = pnand %p588_p2, %p582_p5 }
  0x50   : > { %592 = shalt.err (!%p589_p1)
}
  0x51   : > { %s593_s8 = scalar_lea.vmem %s841_s21, 64  ;;  %s682_s9 = smov [#allocation3]  }
  0x52   : > { %p594_p4 = scmp.ne.s32.totalorder %s841_s21, %s593_s8  ;;  %s598_s10 = sshll.u32 %s682_s9, 4  ;;  %s599_s10 = int_to_ptr.vmem [resolvable:$false] %s598_s10 }
  0x53   : > { %s600_s11 = scalar_lea.vmem %s599_s10, 128  ;;  %p601_p3 = scmp.lt.s32.totalorder %s841_s21, %s599_s10 }
  0x54   : > { %p596_p8 = pnand %p594_p4, %p580_p0  ;;  %p602_p7 = scmp.lt.s32.totalorder %s600_s11, %s593_s8 }
  0x56   : > { %p597_p12 = pneg %p596_p8  ;;  %p603_p10 = por %p602_p7, %p601_p3 }
  0x58   : > { %p604_p13 = pnand %p603_p10, %p597_p12 }
  0x5a   : > { %607 = shalt.err (!%p604_p13)
}
  0x5b   : > { %471 = dma.hbm_to_vmem [thread:$0]  (!%p843_p11), %s839_s24, 64, %s841_s21, %s155_s28  }
  0x5c   : > { %p952_p5 = scmp.ne.s32.totalorder %s947_s20, 0 }
  0x5d   : > { %s875_s17 = sand.u32 (!%p952_p5), 1, %s670_s13   ;;  %p953_p0 = scmp.ne.s32.totalorder (!%p952_p5), %s945_s18, 0 }
  0x5e   : > { %174 = sbr.rel (%p952_p5) target bundleno = 467 (0x1d3), region = 32  ;;  %s425_s27 = sshll.u32 (!%p952_p5), %s875_s17, 2 }
  0x5f   : > { %s177_s29 = scalar_lea.sflag (!%p952_p5), [#allocation4], %s875_s17  ;;  %s180_s30 = scalar_lea.vmem (!%p952_p5), [#allocation3], %s425_s27 }
  0x65   : > { %653 = dma.done.wait (%p953_p0), %s177_s29, 64  }
  0x66   : > { %655 = vsyncadd (%p953_p0), %s177_s29, 4294967232  ;;  %p954_p9 = scmp.eq.s32.totalorder %s731_s16, 0 }
  0x68   : > { %657 = dma.done.wait (%p954_p9), [#allocation7], 256   ;;  %p955_p11 = pmov %p954_p9 }
  0x69   : > { %vm211_vm0 = vcmask 130048   ;;  %v683_v0 = vmov 0.0   ;;  %vm213_vm1 = vcmask 125952   ;;  %v684_v1 = vmov 0.0|0.0   ;;  %v215_v2 = vld [vmem:[%s180_s30] sm:$0xf] }
  0x6a   : > { %659 = vsyncadd (%p955_p11), [#allocation7], 4294967040  ;;  %212 = vst.msk [vmem:[#allocation2] sm:$0xff] %vm211_vm0, %v683_v0  ;;  %445 = vmatprep.subr.bf16.mxu0 %v684_v1  ;;  %v222_v3 = vld [vmem:[%s180_s30] sm:$0xf]  ;;  %s685_s20 = smov 1  }
  0x6b   : > { %214 = vst.msk [vmem:[#allocation2 + $0x8] sm:$0xf] %vm213_vm1, %v683_v0  ;;  %217 = vrot.lane.b32.xlu0 %v215_v2, %s685_s20  ;;  %223 = vst.msk [vmem:[#allocation2 + $0x4] sm:$0xf] %vm213_vm1, %v222_v3  ;;  %v224_v4 = vld [vmem:[%s180_s30] sm:$0xf] }
  0x6c   : > { %vm686_vm2 = vmmov 0   ;;  %s687_s18 = smov 127   ;;  %vm220_vm3 = vcmask 125960   ;;  %vm229_vm4 = vcmask 117760   ;;  %vm239_vm5 = vcmask 1043456   ;;  %v231_v10 = vld [vmem:[#allocation6] sm:$0xff] }
  0x6d   : > { %442 = vmatprep.mubr.msk.f32.mxu0 %vm686_vm2, %v683_v0  ;;  %vm688_vm6 = vmmov 1   ;;  %vm235_vm8 = vcmask 97280   ;;  %s428_s24 = sshll.u32 %s875_s17, 3  ;;  %v234_v11 = vld [vmem:[#allocation8] sm:$0xff]  ;;  %s432_s21 = sshll.u32 %s731_s16, 7 }
  0x6e   : > { %vm447_vm7 = vmpackc.low %vm239_vm5, %vm688_vm6  ;;  %s210_s23 = scalar_lea.vmem [#allocation9], %s428_s24  ;;  %s893_s5 = scalar_lea.hbm %s941_s3, %s432_s21 }
  0x6f   : > { %226 = vrot.lane.b32.xlu0 %v224_v4, %s687_s18  ;;  %s328_s28 = sshll.u32 %s210_s23, 4  ;;  %s315_s6 = scalar_lea.sflag [#allocation5], %s875_s17  ;;  %s895_s28 = int_to_ptr.vmem [resolvable:$true] %s328_s28 }
  0x70   : > { %s608_s8 = scalar_lea.vmem %s895_s28, 128  ;;  %s689_s16 = smov [#allocation9]  }
  0x71   : > { %p609_p2 = scmp.ne.s32.totalorder %s895_s28, %s608_s8  ;;  %s612_s9 = sshll.u32 %s689_s16, 4  ;;  %s613_s9 = int_to_ptr.vmem [resolvable:$false] %s612_s9 }
  0x72   : > { %s614_s10 = scalar_lea.vmem %s613_s9, 256  ;;  %p615_p8 = scmp.lt.s32.totalorder %s895_s28, %s613_s9 }
  0x73   : > { %p610_p1 = pnand %p609_p2, %p829_p6  ;;  %p616_p12 = scmp.lt.s32.totalorder %s614_s10, %s608_s8 }
  0x75   : > { %p611_p4 = pneg %p610_p1  ;;  %p617_p3 = por %p616_p12, %p615_p8 }
  0x77   : > { %p618_p7 = pnand %p617_p3, %p611_p4 }
  0xdd   : > { %v218_v5 = vpop.permute.xlu0 %217 }
  0xde   : > { %221 = vst.msk [vmem:[#allocation2] sm:$0xf] %vm220_vm3, %v218_v5 }
  0xe1   : > { %v227_v6 = vpop.permute.xlu0 %226 }
  0xe2   : > { %230 = vst.msk [vmem:[#allocation2 + $0x8] sm:$0xf] %vm229_vm4, %v227_v6 }
  0xe5   : > { %v232_v7 = vld [vmem:[#allocation2] sm:$0xff] }
  0xe9   : > { %v233_v8 = vld [vmem:[#allocation2 + $0x8] sm:$0xf] }
  0xea   : > { %v446_v9 = vpack.c.bf16 %v233_v8, %v232_v7 }
  0xec   : > { %448 = vmatpush3.bf16.msk.msra.mxu0 %vm447_vm7, %v446_v9 }
  0xef   : > { %443 = vmatmul.mubr.msk.f32.vlgmr.msra.gmra.mrb[0].mxu0 %vm235_vm8, %v231_v10 }
 0x1c2   : > { %v309_v12 = vpop.f32.mrb[0].mxu0 }
 0x1c3   : > { %v310_v13 = vadd.f32 %v309_v12, %v234_v11  ;;  %v444_v14 = vpop.f32.mrb[1].mxu0 }
 0x1c5   : > { %313 = vst.msk [vmem:[%s210_s23] sm:$0xff] %vm211_vm0, %v310_v13 }
 0x1c6   : > { %621 = shalt.err (!%p618_p7)
}
 0x1c7   : > { %s622_s11 = scalar_lea.hbm %s893_s5, 128  ;;  %s626_s29 = scalar_lea.hbm %s941_s3, 256 }
 0x1c8   : > { %p623_p10 = scmp.ne.s32.totalorder %s893_s5, %s622_s11  ;;  %p627_p0 = scmp.lt.u32.totalorder %s893_s5, %s941_s3 }
 0x1c9   : > { %p628_p9 = scmp.lt.u32.totalorder %s626_s29, %s622_s11  ;;  %p630_p2 = scmp.lt.u32.totalorder %s622_s11, %s893_s5 }
 0x1ca   : > { %p624_p13 = pnand %p623_p10, %p829_p6 }
 0x1cb   : > { %p629_p11 = por %p628_p9, %p627_p0 }
 0x1cc   : > { %p625_p5 = pneg %p624_p13 }
 0x1cd   : > { %p631_p1 = por %p630_p2, %p629_p11 }
 0x1cf   : > { %p632_p4 = pnand %p631_p1, %p625_p5 }
 0x1d1   : > { %635 = shalt.err (!%p632_p4)
}
 0x1d2   : > { %459 = dma.vmem_to_hbm [thread:$0]  (%p829_p6), %s895_s28, 128, %s893_s5, %s315_s6  }
 0x1d3 PF: > { %s340_s18 = sand.u32 1, %s666_s12   ;;  %p956_p8 = scmp.ne.s32.totalorder %s946_s19, 0 }
 0x1d4   : > { %p957_p12 = scmp.ge.s32.totalorder %s678_s15, 2  ;;  %s341_s24 = scalar_lea.sflag [#allocation5], %s340_s18 }
 0x1d6   : > { %p473_p3 = pnand %p957_p12, %p956_p8 }
 0x1d8   : > { %661 = dma.done.wait (!%p473_p3), %s341_s24, 128  }
 0x1d9   : > { %663 = vsyncadd (!%p473_p3), %s341_s24, 4294967168  ;;  %p17_p7 = scmp.ge.s32.totalorder %s766_s26, 4   ;;  %s958_s12 = smov %s670_s13 }
 0x1da   : > { %s959_s13 = smov %s674_s14  ;;  %s960_s14 = smov %s825_s25 }
 0x1db   : > { %s961_s15 = smov %s766_s26  ;;  %19 = sbr.rel (!%p17_p7) target bundleno = 6 (0x6), region = 85 }
 0x1e2   :  { %346 = vsyncpa [#allocation4], 1 }
 0x1e3   :  { %348 = vsyncpa [#allocation4 + $0x1], 1 }
 0x1e4   :  { %349 = vsyncpa [#allocation7], 1 }
 0x1e5   :  { %350 = vsyncpa [#allocation5], 1 }
 0x1e6   :  { %352 = vsyncpa [#allocation5 + $0x1], 1 }

</bundles_post_ra>
